<compile_context>
chip_gen: v7x
topology: tpu7x:2x2x1
jax: 0.10.0
libtpu: 0.0.40
codegen_flags: <defaults>
</compile_context>

<pallas_src>
import functools

import jax
import jax.numpy as jnp
from jax.experimental import pallas as pl
from jax.experimental.pallas import tpu as pltpu

FRAME_LEN = 16                       # frame_len
OUT_DIM = 32                         # out_dim
KSIZE = 3                            # frame_kernel_size
COND_DIM = 64                        # hardcoded input dim of cont_fc in the torch module
PAD_LEN = (KSIZE - 1) * FRAME_LEN    # required_pad_left (causal)
FC_IN = KSIZE * FRAME_LEN            # fc_input_dim


# ---------------------------------------------------------------------------
# Fused kernel: pad matmul -> causal concat (value) -> im2col -> one MXU pass
# against the gate-folded weight -> GLU -> lane-dense (bb, T*OUT) store.
# ---------------------------------------------------------------------------
def _fused_kernel(x0_ref, xf_ref, wpadT_ref, wcomb_ref, out_ref, *,
                  bb, n_frames, frame_len, ksize, out_dim):
    f32 = jnp.float32
    T, F, K = n_frames, frame_len, ksize
    KF = K * F

    # 1) continuation-padding frames: (bb, (K-1)*F)
    pad = jnp.tanh(jnp.dot(x0_ref[...], wpadT_ref[...],
                           preferred_element_type=f32))

    # 2) causally padded flat sequence as a VALUE (no scratch store/reload): (bb, (K-1)*F + T*F)
    seq = jnp.concatenate([pad, xf_ref[...]], axis=-1)

    # 3) im2col: T windows of width K*F at stride F, stacked t-major along rows -> (T*bb, K*F)
    windows = jnp.concatenate(
        [seq[:, t * F: t * F + KF] for t in range(T)], axis=0)

    # 4) single contraction-48 MXU pass with the GLU gate folded in -> [y | g]
    yg = jnp.dot(windows, wcomb_ref[...], preferred_element_type=f32)  # (T*bb, 2*OUT)
    y = yg[:, :out_dim]
    g = yg[:, out_dim:]

    # 5) GLU; sigmoid via the tanh identity (one fewer EUP op per element)
    glu = jnp.tanh(y) * (0.5 * jnp.tanh(0.5 * g) + 0.5)                # (T*bb, OUT)

    # 6) lane-dense output slab (bb, T*OUT): frame t lives at lane offset t*OUT
    out_ref[...] = jnp.concatenate(
        [glu[t * bb:(t + 1) * bb, :] for t in range(T)], axis=-1
    ).astype(out_ref.dtype)


# ---------------------------------------------------------------------------
# Generation-aware sizing helpers.
# ---------------------------------------------------------------------------
def _round_up(n, m):
    return ((n + m - 1) // m) * m


def _vmem_limit_bytes():
    """Explicit scoped-VMEM limit: half the chip's physical VMEM (v5e/v6e 128 MiB -> 64,
    v7x 64 MiB -> 32), conservative fallback if the query is unavailable."""
    cap = None
    try:
        cap = int(getattr(pltpu.get_tpu_info(), "vmem_capacity_bytes", 0)) or None
    except Exception:
        cap = None
    if cap is None:
        cap = 64 << 20
    return max(16 << 20, cap // 2)


def _num_tensorcores():
    try:
        kind = jax.devices()[0].device_kind.lower()
        if "v7" in kind:
            return 2
    except Exception:
        pass
    return 1


def _pick_block_b(batch, T, F, out_dim, cond, ksize, vmem_limit):
    """Batch rows per grid step, sized from a padded-VMEM budget (lane dim pads to 128),
    capped at ~8K matmul rows per step, multiple of 8 (sublane tile)."""
    lane = 128
    pad_c = lambda c: _round_up(max(int(c), 1), lane)
    per_row = 4 * (
        2 * pad_c(cond)                   # x0 block (double-buffered)
        + 2 * pad_c(T * F)                # flat x block (double-buffered)
        + 2 * pad_c(T * out_dim)          # out block (double-buffered)
        + pad_c((T + ksize - 1) * F)      # seq value
        + T * pad_c(ksize * F)            # im2col windows value
        + 2 * T * pad_c(2 * out_dim)      # yg + glu intermediates
    )
    budget = vmem_limit // 2              # headroom for compiler scratch / spills
    bb = max(1, budget // per_row)
    bb = min(bb, max(1, 8192 // max(T, 1)))       # target <= ~8K matmul rows per step
    bb = max(8, (bb // 8) * 8)
    bb = min(bb, _round_up(batch, 8))

    # v7x has 2 TensorCores: prefer an even number of equal-size grid steps so the
    # "parallel" axis shards cleanly.  v5e/v6e have 1 TC: never split just for cores.
    if _num_tensorcores() >= 2:
        steps = pl.cdiv(batch, bb)
        if steps == 1 and _round_up(batch, 8) >= 16:
            bb = max(8, _round_up(pl.cdiv(batch, 2), 8))
        elif steps > 1 and steps % 2 == 1:
            bb = max(8, _round_up(pl.cdiv(batch, steps + 1), 8))
    return int(bb)


# ---------------------------------------------------------------------------
# One-time weight layout prep (keep OFF the per-call path).
# ---------------------------------------------------------------------------
def prepare_weights(w_pad, w_fc, w_gate):
    """w_pad: (PAD_LEN, 64), w_fc: (OUT, K*F), w_gate: (OUT, OUT) -- effective
    (post weight-norm) weights.  Returns (w_padT, w_comb) for the kernel."""
    wfcT = jnp.transpose(w_fc)                                         # (K*F, OUT)
    wg = jnp.dot(wfcT, jnp.transpose(w_gate),
                 precision=jax.lax.Precision.HIGHEST)                  # (K*F, OUT)
    w_comb = jnp.concatenate([wfcT, wg], axis=-1)                      # (K*F, 2*OUT)
    w_padT = jnp.transpose(w_pad)                                      # (64, (K-1)*F)
    return w_padT, w_comb


# ---------------------------------------------------------------------------
# Forward wrapper (single pallas_call).
# ---------------------------------------------------------------------------
@functools.partial(jax.jit, static_argnames=("block_b",))
def cont_framewise_conv(x, x0, w_padT, w_comb, *, block_b=None):
    B, T, F = x.shape
    KF, two_out = w_comb.shape
    out_dim = two_out // 2
    K = KF // F
    cond = x0.shape[-1]

    vmem_limit = _vmem_limit_bytes()
    if block_b is None:
        block_b = _pick_block_b(B, T, F, out_dim, cond, K, vmem_limit)
    bb = int(block_b)

    # Lane-dense input layout (free reshape at XLA level): frames flattened into lanes.
    x_flat = x.reshape(B, T * F).astype(jnp.float32)
    x0f = x0.astype(jnp.float32)

    # Pad the batch to a block multiple (tail rows computed on zeros, sliced off below).
    Bp = pl.cdiv(B, bb) * bb
    if Bp != B:
        x_flat = jnp.pad(x_flat, ((0, Bp - B), (0, 0)))
        x0f = jnp.pad(x0f, ((0, Bp - B), (0, 0)))
    grid = (Bp // bb,)

    kernel = functools.partial(_fused_kernel, bb=bb, n_frames=T, frame_len=F,
                               ksize=K, out_dim=out_dim)

    out_flat = pl.pallas_call(
        kernel,
        out_shape=jax.ShapeDtypeStruct((Bp, T * out_dim), jnp.float32),
        grid_spec=pltpu.PrefetchScalarGridSpec(
            num_scalar_prefetch=0,
            grid=grid,
            in_specs=[
                pl.BlockSpec((bb, cond), lambda b: (b, 0)),        # x0
                pl.BlockSpec((bb, T * F), lambda b: (b, 0)),       # x (flattened frames)
                pl.BlockSpec((cond, KF - F), lambda b: (0, 0)),    # W_pad.T
                pl.BlockSpec((KF, two_out), lambda b: (0, 0)),     # gate-folded combined W
            ],
            out_specs=pl.BlockSpec((bb, T * out_dim), lambda b: (b, 0)),
        ),
        compiler_params=pltpu.CompilerParams(
            dimension_semantics=("parallel",),
            vmem_limit_bytes=int(vmem_limit),
        ),
    )(x0f, x_flat, w_padT, w_comb)

    return out_flat[:B].reshape(B, T, out_dim)


# ---------------------------------------------------------------------------
# Deterministic parameter init (weight_norm reparam: W = g * v / ||v||_row).
# TODO(synk): torch orthogonal_ init not reproduced bit-exactly; deterministic PRNG init instead.
# ---------------------------------------------------------------------------
def _weight_norm_weight(key, out_features, in_features):
    kv, kg = jax.random.split(key)
    v = jax.random.normal(kv, (out_features, in_features), jnp.float32) * 0.1
    g = jax.random.uniform(kg, (out_features, 1), jnp.float32, minval=0.5, maxval=1.5)
    return g * v / jnp.linalg.norm(v, axis=1, keepdims=True)


# Pure-JAX reference mirroring the torch forward (reshape -> cont_fc -> cat -> unfold -> fc -> GLU).
def _reference(x, x0, w_pad, w_fc, w_gate):
    B, T, F = x.shape
    pad = jnp.tanh(x0 @ w_pad.T)                                     # (B, PAD_LEN)
    x_flat = x.reshape(B, T * F)
    xp = jnp.concatenate([pad, x_flat], axis=-1)                     # (B, PAD_LEN + T*F)
    windows = jnp.stack([xp[:, t * F: t * F + KSIZE * F] for t in range(T)], axis=1)
    y = windows @ w_fc.T
    return jnp.tanh(y) * jax.nn.sigmoid(y @ w_gate.T)


if __name__ == "__main__":
    key = jax.random.PRNGKey(0)
    kx, kx0, k1, k2, k3, kx2, kx02 = jax.random.split(key, 7)

    w_pad = _weight_norm_weight(k1, PAD_LEN, COND_DIM)    # cont_fc Linear(64, 32)
    w_fc = _weight_norm_weight(k2, OUT_DIM, FC_IN)        # fc Linear(48, 32)
    w_gate = _weight_norm_weight(k3, OUT_DIM, OUT_DIM)    # GLU gate Linear(32, 32)

    # One-time weight layout prep (transposes + GLU-gate folding), off the per-call path.
    w_padT, w_comb = prepare_weights(w_pad, w_fc, w_gate)

    # Case 1: small batch (matches the module's typical call shape).
    B, T = 2, 8
    x = jax.random.normal(kx, (B, T, FRAME_LEN), jnp.float32)
    x0 = jax.random.normal(kx0, (B, COND_DIM), jnp.float32)
    out = jax.block_until_ready(cont_framewise_conv(x, x0, w_padT, w_comb))
    ref = _reference(x, x0, w_pad, w_fc, w_gate)
    assert out.shape == (B, T, OUT_DIM), out.shape
    err = float(jnp.max(jnp.abs(out - ref)))
    assert jnp.allclose(out, ref, atol=1e-5, rtol=1e-5), err

    # Case 2: batch not a multiple of the block (exercises the pad+slice path).
    B2 = 13
    x2 = jax.random.normal(kx2, (B2, T, FRAME_LEN), jnp.float32)
    x02 = jax.random.normal(kx02, (B2, COND_DIM), jnp.float32)
    out2 = jax.block_until_ready(cont_framewise_conv(x2, x02, w_padT, w_comb))
    ref2 = _reference(x2, x02, w_pad, w_fc, w_gate)
    assert out2.shape == (B2, T, OUT_DIM), out2.shape
    err2 = float(jnp.max(jnp.abs(out2 - ref2)))
    assert jnp.allclose(out2, ref2, atol=1e-5, rtol=1e-5), err2

    print("KERNEL_OK")
</pallas_src>

<mosaic_0001>
module attributes {stable_mosaic.version = 11 : i64} {
  func.func @_fused_kernel(%arg0: i32, %arg1: memref<8x64xf32, #tpu.memory_space<vmem>>, %arg2: memref<8x128xf32, #tpu.memory_space<vmem>>, %arg3: memref<64x32xf32, #tpu.memory_space<vmem>>, %arg4: memref<48x64xf32, #tpu.memory_space<vmem>>, %arg5: memref<8x256xf32, #tpu.memory_space<vmem>>) attributes {dimension_semantics = [#tpu.dimension_semantics<parallel>], iteration_bounds = array<i64: 1>, scalar_prefetch = 0 : i64, scratch_operands = 0 : i64, tpu.core_type = #tpu.core_type<tc>, window_params = [{transform_indices = @transform_0, window_bounds = array<i64: 8, 64>}, {transform_indices = @transform_1, window_bounds = array<i64: 8, 128>}, {pipeline_mode = #tpu.pipeline_mode<synchronous>, transform_indices = @transform_2, window_bounds = array<i64: 64, 32>}, {pipeline_mode = #tpu.pipeline_mode<synchronous>, transform_indices = @transform_3, window_bounds = array<i64: 48, 64>}, {transform_indices = @transform_4, window_bounds = array<i64: 8, 256>}]} {
    %c0 = arith.constant 0 : index
    %c0_0 = arith.constant 0 : index
    %0 = vector.load %arg1[%c0, %c0_0] : memref<8x64xf32, #tpu.memory_space<vmem>>, vector<8x64xf32>
    %c0_1 = arith.constant 0 : index
    %c0_2 = arith.constant 0 : index
    %1 = vector.load %arg3[%c0_1, %c0_2] : memref<64x32xf32, #tpu.memory_space<vmem>>, vector<64x32xf32>
    %cst = arith.constant dense<0.000000e+00> : vector<8x32xf32>
    %2 = tpu.matmul %0, %1, %cst {dimension_numbers = #tpu.dot_dimension_numbers<[1], [0], [0], [1], [0, 0, 1, 1], [], []>} : vector<8x64xf32>, vector<64x32xf32>, vector<8x32xf32> -> vector<8x32xf32>
    %3 = math.tanh %2 : vector<8x32xf32>
    %c0_3 = arith.constant 0 : index
    %c0_4 = arith.constant 0 : index
    %4 = vector.load %arg2[%c0_3, %c0_4] : memref<8x128xf32, #tpu.memory_space<vmem>>, vector<8x128xf32>
    %5 = tpu.concatenate %3, %4 in 1 : vector<8x32xf32>, vector<8x128xf32> -> vector<8x160xf32>
    %6 = vector.extract_strided_slice %5 {offsets = [0, 0], sizes = [8, 48], strides = [1, 1]} : vector<8x160xf32> to vector<8x48xf32>
    %7 = vector.extract_strided_slice %5 {offsets = [0, 16], sizes = [8, 48], strides = [1, 1]} : vector<8x160xf32> to vector<8x48xf32>
    %8 = vector.extract_strided_slice %5 {offsets = [0, 32], sizes = [8, 48], strides = [1, 1]} : vector<8x160xf32> to vector<8x48xf32>
    %9 = vector.extract_strided_slice %5 {offsets = [0, 48], sizes = [8, 48], strides = [1, 1]} : vector<8x160xf32> to vector<8x48xf32>
    %10 = vector.extract_strided_slice %5 {offsets = [0, 64], sizes = [8, 48], strides = [1, 1]} : vector<8x160xf32> to vector<8x48xf32>
    %11 = vector.extract_strided_slice %5 {offsets = [0, 80], sizes = [8, 48], strides = [1, 1]} : vector<8x160xf32> to vector<8x48xf32>
    %12 = vector.extract_strided_slice %5 {offsets = [0, 96], sizes = [8, 48], strides = [1, 1]} : vector<8x160xf32> to vector<8x48xf32>
    %13 = vector.extract_strided_slice %5 {offsets = [0, 112], sizes = [8, 48], strides = [1, 1]} : vector<8x160xf32> to vector<8x48xf32>
    %14 = tpu.concatenate %6, %7, %8, %9, %10, %11, %12, %13 in 0 : vector<8x48xf32>, vector<8x48xf32>, vector<8x48xf32>, vector<8x48xf32>, vector<8x48xf32>, vector<8x48xf32>, vector<8x48xf32>, vector<8x48xf32> -> vector<64x48xf32>
    %c0_5 = arith.constant 0 : index
    %c0_6 = arith.constant 0 : index
    %15 = vector.load %arg4[%c0_5, %c0_6] : memref<48x64xf32, #tpu.memory_space<vmem>>, vector<48x64xf32>
    %cst_7 = arith.constant dense<0.000000e+00> : vector<64x64xf32>
    %16 = tpu.matmul %14, %15, %cst_7 {dimension_numbers = #tpu.dot_dimension_numbers<[1], [0], [0], [1], [0, 0, 1, 1], [], []>} : vector<64x48xf32>, vector<48x64xf32>, vector<64x64xf32> -> vector<64x64xf32>
    %17 = vector.extract_strided_slice %16 {offsets = [0, 0], sizes = [64, 32], strides = [1, 1]} : vector<64x64xf32> to vector<64x32xf32>
    %18 = vector.extract_strided_slice %16 {offsets = [0, 32], sizes = [64, 32], strides = [1, 1]} : vector<64x64xf32> to vector<64x32xf32>
    %19 = math.tanh %17 : vector<64x32xf32>
    %cst_8 = arith.constant 5.000000e-01 : f32
    %20 = vector.broadcast %cst_8 : f32 to vector<64x32xf32>
    %21 = arith.mulf %20, %18 : vector<64x32xf32>
    %22 = math.tanh %21 : vector<64x32xf32>
    %cst_9 = arith.constant 5.000000e-01 : f32
    %23 = vector.broadcast %cst_9 : f32 to vector<64x32xf32>
    %24 = arith.mulf %23, %22 : vector<64x32xf32>
    %cst_10 = arith.constant 5.000000e-01 : f32
    %25 = vector.broadcast %cst_10 : f32 to vector<64x32xf32>
    %26 = arith.addf %24, %25 : vector<64x32xf32>
    %27 = arith.mulf %19, %26 : vector<64x32xf32>
    %28 = vector.extract_strided_slice %27 {offsets = [0, 0], sizes = [8, 32], strides = [1, 1]} : vector<64x32xf32> to vector<8x32xf32>
    %29 = vector.extract_strided_slice %27 {offsets = [8, 0], sizes = [8, 32], strides = [1, 1]} : vector<64x32xf32> to vector<8x32xf32>
    %30 = vector.extract_strided_slice %27 {offsets = [16, 0], sizes = [8, 32], strides = [1, 1]} : vector<64x32xf32> to vector<8x32xf32>
    %31 = vector.extract_strided_slice %27 {offsets = [24, 0], sizes = [8, 32], strides = [1, 1]} : vector<64x32xf32> to vector<8x32xf32>
    %32 = vector.extract_strided_slice %27 {offsets = [32, 0], sizes = [8, 32], strides = [1, 1]} : vector<64x32xf32> to vector<8x32xf32>
    %33 = vector.extract_strided_slice %27 {offsets = [40, 0], sizes = [8, 32], strides = [1, 1]} : vector<64x32xf32> to vector<8x32xf32>
    %34 = vector.extract_strided_slice %27 {offsets = [48, 0], sizes = [8, 32], strides = [1, 1]} : vector<64x32xf32> to vector<8x32xf32>
    %35 = vector.extract_strided_slice %27 {offsets = [56, 0], sizes = [8, 32], strides = [1, 1]} : vector<64x32xf32> to vector<8x32xf32>
    %36 = tpu.concatenate %28, %29, %30, %31, %32, %33, %34, %35 in 1 : vector<8x32xf32>, vector<8x32xf32>, vector<8x32xf32>, vector<8x32xf32>, vector<8x32xf32>, vector<8x32xf32>, vector<8x32xf32>, vector<8x32xf32> -> vector<8x256xf32>
    %c0_11 = arith.constant 0 : index
    %c0_12 = arith.constant 0 : index
    %37 = vector.load %arg5[%c0_11, %c0_12] : memref<8x256xf32, #tpu.memory_space<vmem>>, vector<8x256xf32>
    tpu.vector_store %arg5[%c0_11, %c0_12], %36 {strides = array<i32>} : memref<8x256xf32, #tpu.memory_space<vmem>>, vector<8x256xf32>,
    return
  }
  func.func @transform_0(%arg0: i32) -> (i32, i32) {
    %c0_i32 = arith.constant 0 : i32
    %c0_i32_0 = arith.constant 0 : i32
    return %arg0, %c0_i32 : i32, i32
  }
  func.func @transform_1(%arg0: i32) -> (i32, i32) {
    %c0_i32 = arith.constant 0 : i32
    %c0_i32_0 = arith.constant 0 : i32
    return %arg0, %c0_i32 : i32, i32
  }
  func.func @transform_2(%arg0: i32) -> (i32, i32) {
    %c0_i32 = arith.constant 0 : i32
    %c0_i32_0 = arith.constant 0 : i32
    %c0_i32_1 = arith.constant 0 : i32
    return %c0_i32, %c0_i32_0 : i32, i32
  }
  func.func @transform_3(%arg0: i32) -> (i32, i32) {
    %c0_i32 = arith.constant 0 : i32
    %c0_i32_0 = arith.constant 0 : i32
    %c0_i32_1 = arith.constant 0 : i32
    return %c0_i32, %c0_i32_0 : i32, i32
  }
  func.func @transform_4(%arg0: i32) -> (i32, i32) {
    %c0_i32 = arith.constant 0 : i32
    %c0_i32_0 = arith.constant 0 : i32
    return %arg0, %c0_i32 : i32, i32
  }
}

</mosaic_0001>

<bundles_post_ra>
// kernel: cont_framewise_conv.1
= control target key start
LH: loop header
LB: loop body
LE: loop exit
PB: predicated region body
PF: predicated region fallthrough
CT: control target
= control target key end

     0   :  { %v518_v0 = vmov 0.0|0.0   ;;  %vm519_vm0 = vmmov 0   ;;  %v520_v4 = vmov 0.0   ;;  %s521_s29 = smov 32   ;;  %vm26_vm1 = vcmask 523264   ;;  %s522_s19 = smov 96   ;;  %s649_s2 = inlined_call_operand.vmem [shape: f32[64,32], index: 2, kind: input, shape index: {}]   ;;  %s650_s1 = inlined_call_operand.vmem [shape: f32[8,128], index: 1, kind: input, shape index: {}]   ;;  %s651_s0 = inlined_call_operand.vmem [shape: f32[8,64], index: 0, kind: input, shape index: {}]   ;;  %s652_s3 = inlined_call_operand.vmem [shape: f32[48,64], index: 3, kind: input, shape index: {}]   ;;  %s653_s4 = inlined_call_operand.vmem [shape: f32[8,256], index: 4, kind: output, shape index: {}]  }
   0x1   :  { %450 = vmatprep.subr.bf16.mxu0 %v518_v0  ;;  %v18_v1 = vld [vmem:[%s649_s2] sm:$0xff]  ;;  %v19_v2 = vld [vmem:[%s649_s2 + $0x8] sm:$0xff]  ;;  %v20_v3 = vld [vmem:[%s649_s2 + $0x10] sm:$0xff]  ;;  %423 = vmatprep.mubr.msk.f32.mxu0 %vm519_vm0, %v520_v4  ;;  %vm106_vm2 = vcmask 261120   ;;  %vm136_vm3 = vcmask 392192   ;;  %s523_s20 = smov 112  }
   0x2   :  { %v451_v5 = vpack.c.bf16 %v19_v2, %v18_v1  ;;  %v21_v6 = vld [vmem:[%s649_s2 + $0x18] sm:$0xff]  ;;  %v101_v8 = vld [vmem:[%s650_s1] sm:$0xff]  ;;  %v23_v10 = vld [vmem:[%s649_s2 + $0x28] sm:$0xff]  ;;  %s525_s21 = smov 64   ;;  %s526_s22 = smov 48   ;;  %vm128_vm4 = vcmask 130048  }
   0x3   :  { %v454_v7 = vpack.c.bf16 %v21_v6, %v20_v3  ;;  %v22_v9 = vld [vmem:[%s649_s2 + $0x20] sm:$0xff]  ;;  %103 = vrot.lane.b32.xlu0 %v101_v8, %s521_s29  ;;  %v24_v12 = vld [vmem:[%s649_s2 + $0x30] sm:$0xff]  ;;  %v25_v13 = vld [vmem:[%s649_s2 + $0x38] sm:$0xff]  ;;  %s527_s23 = smov 16   ;;  %vm364_vm5 = vcmask 785408  }
   0x4   :  { %452 = vmatpush3.bf16.msra.mxu0 %v451_v5  ;;  %v457_v11 = vpack.c.bf16 %v23_v10, %v22_v9  ;;  %v460_v14 = vpack.c.bf16 %v25_v13, %v24_v12  ;;  %v17_v15 = vld [vmem:[%s651_s0] sm:$0xff]  ;;  %v131_v18 = vld [vmem:[%s652_s3 + $0x8] sm:$0xff]  ;;  %v132_v19 = vld [vmem:[%s652_s3 + $0x10] sm:$0xff] }
   0x5   :  { %453 = vmatprep.subr.bf16.mxu0 %v518_v0  ;;  %v130_v17 = vld [vmem:[%s652_s3] sm:$0xff]  ;;  %v133_v21 = vld [vmem:[%s652_s3 + $0x18] sm:$0xff]  ;;  %v135_v24 = vld [vmem:[%s652_s3 + $0x28] sm:$0xff] }
   0x6   :  { %v462_v20 = vpack.c.bf16 %v131_v18, %v130_v17  ;;  %v466_v22 = vpack.c.bf16 %v133_v21, %v132_v19  ;;  %v134_v23 = vld [vmem:[%s652_s3 + $0x20] sm:$0xff]  ;;  %s524_s3 = smov 80  }
   0x7   :  { %v470_v25 = vpack.c.bf16 %v135_v24, %v134_v23 }
   0x8   :  { %455 = vmatpush3.bf16.msra.mxu0 %v454_v7  ;;  %463 = vmatprep.subr.bf16.mxu1 %v462_v20 }
   0x9   :  { %456 = vmatprep.subr.bf16.mxu0 %v518_v0  ;;  %465 = vmatpush3.bf16.msra.mxu1 %v462_v20 }
   0xa   :  { %467 = vmatprep.subr.bf16.mxu1 %v466_v22 }
   0xc   :  { %458 = vmatpush3.bf16.msra.mxu0 %v457_v11 }
   0xd   :  { %459 = vmatprep.subr.bf16.mxu0 %v518_v0  ;;  %469 = vmatpush3.bf16.msra.mxu1 %v466_v22 }
   0xe   :  { %471 = vmatprep.subr.bf16.mxu1 %v470_v25 }
  0x10   :  { %461 = vmatpush3.bf16.msra.mxu0 %v460_v14 }
  0x11   :  { %473 = vmatpush3.bf16.msra.mxu1 %v470_v25 }
  0x13   :  { %424 = vmatmul.mubr.msk.f32.vlgmr.msra.gmra.mrb[0].mxu0 %vm26_vm1, %v17_v15 }
  0x75   :  { %v104_v16 = vpop.permute.xlu0 %103 }
  0x76   :  { %121 = vrot.lane.b32.xlu1 %v104_v16, %s521_s29 }
  0xe6   :  { %v96_v26 = vpop.f32.mrb[0].mxu0 }
  0xe7   :  { %484 = vtanh.f32 %v96_v26  ;;  %v425_v27 = vpop.f32.mrb[1].mxu0 }
  0xe8   :  { %v122_v30 = vpop.permute.xlu1 %121 }
  0xf1   :  { %v485_v28 = vpop.eup %484 }
  0xf2   :  { %v107_v29 = vsel %vm106_vm2, %v485_v28, %v104_v16 }
  0xf3   :  { %111 = vrot.lane.b32.xlu1 %v107_v29, %s522_s19  ;;  %109 = vrot.lane.b32.xlu0 %v107_v29, %s523_s20 }
  0xf4   :  { %438 = vmatprep.mubr.msk.f32.mxu1 %vm136_vm3, %v107_v29 }
  0xf7   :  { %113 = vrot.lane.b32.xlu1 %v107_v29, %s524_s3  ;;  %115 = vrot.lane.b32.xlu0 %v107_v29, %s525_s21 }
  0xfb   :  { %117 = vrot.lane.b32.xlu1 %v107_v29, %s526_s22  ;;  %119 = vrot.lane.b32.xlu0 %v107_v29, %s521_s29 }
  0xff   :  { %126 = vrot.lane.b32.xlu1 %v104_v16, %s527_s23  ;;  %124 = vrot.lane.b32.xlu0 %v107_v29, %s527_s23 }
 0x165   :  { %v112_v31 = vpop.permute.xlu1 %111  ;;  %v110_v32 = vpop.permute.xlu0 %109 }
 0x166   :  { %439 = vmatmul.mubr.msk.f32.vlgmr.msra.gmra.mrb[0].mxu1 %vm136_vm3, %v110_v32 }
 0x167   :  { %441 = vmatprep.mubr.msk.f32.mxu1 %vm136_vm3, %v112_v31 }
 0x169   :  { %v114_v33 = vpop.permute.xlu1 %113  ;;  %v116_v34 = vpop.permute.xlu0 %115 }
 0x16a   :  { %442 = vmatmul.mubr.msk.f32.gmra.mrb[2].mxu1 %vm136_vm3, %v114_v33 }
 0x16b   :  { %444 = vmatprep.mubr.msk.f32.mxu1 %vm136_vm3, %v116_v34 }
 0x16d   :  { %v118_v35 = vpop.permute.xlu1 %117  ;;  %v120_v36 = vpop.permute.xlu0 %119 }
 0x16e   :  { %v123_v37 = vsel %vm106_vm2, %v120_v36, %v122_v30  ;;  %445 = vmatmul.mubr.msk.f32.gmra.mrb[4].mxu1 %vm136_vm3, %v118_v35 }
 0x16f   :  { %447 = vmatprep.mubr.msk.f32.mxu1 %vm136_vm3, %v123_v37 }
 0x171   :  { %v127_v38 = vpop.permute.xlu1 %126  ;;  %v125_v39 = vpop.permute.xlu0 %124 }
 0x172   :  { %v129_v40 = vsel %vm128_vm4, %v125_v39, %v127_v38 }
 0x173   :  { %448 = vmatmul.mubr.msk.f32.gmra.mrb[6].mxu1 %vm136_vm3, %v129_v40 }
 0x239   :  { %v440_v41 = vpop.f32.mrb[0].mxu1 }
 0x23a   :  { %v267_v42 = vmul.f32 0.5, %v440_v41  ;;  %v617_v43 = vpop.f32.mrb[1].mxu1 }
 0x23b   :  { %v266_v48 = vmul.f32 0.5, %v617_v43 }
 0x23c   :  { %486 = vtanh.f32 %v267_v42 }
 0x23d   :  { %v443_v44 = vpop.f32.mrb[2].mxu1 }
 0x23e   :  { %v269_v45 = vmul.f32 0.5, %v443_v44  ;;  %v229_v46 = vpop.f32.mrb[3].mxu1 }
 0x23f   :  { %v268_v47 = vmul.f32 0.5, %v229_v46 }
 0x240   :  { %488 = vtanh.f32 %v269_v45 }
 0x241   :  { %490 = vtanh.f32 %v268_v47  ;;  %v446_v49 = vpop.f32.mrb[4].mxu1 }
 0x242   :  { %v271_v50 = vmul.f32 0.5, %v446_v49  ;;  %v620_v51 = vpop.f32.mrb[5].mxu1 }
 0x243   :  { %v270_v60 = vmul.f32 0.5, %v620_v51 }
 0x244   :  { %492 = vtanh.f32 %v271_v50 }
 0x245   :  { %494 = vtanh.f32 %v266_v48 }
 0x246   :  { %v487_v52 = vpop.eup %486  ;;  %v449_v53 = vpop.f32.mrb[6].mxu1 }
 0x247   :  { %v273_v54 = vmul.f32 0.5, %v449_v53  ;;  %v249_v55 = vpop.f32.mrb[7].mxu1  ;;  %v283_v56 = vmul.f32 0.5, %v487_v52 }
 0x248   :  { %v272_v57 = vmul.f32 0.5, %v249_v55 }
 0x249   :  { %496 = vtanh.f32 %v273_v54  ;;  %v291_v58 = vadd.f32 0.5, %v283_v56 }
 0x24a   :  { %v489_v59 = vpop.eup %488  ;;  %498 = vtanh.f32 %v272_v57 }
 0x24b   :  { %v491_v61 = vpop.eup %490  ;;  %308 = vrot.lane.b32.xlu0 %v291_v58, %s522_s19  ;;  %500 = vtanh.f32 %v270_v60  ;;  %v285_v1 = vmul.f32 0.5, %v489_v59 }
 0x24c   :  { %v284_v62 = vmul.f32 0.5, %v491_v61  ;;  %502 = vtanh.f32 %v440_v41 }
 0x24d   :  { %v293_v5 = vadd.f32 0.5, %v285_v1  ;;  %504 = vtanh.f32 %v229_v46 }
 0x24e   :  { %v493_v63 = vpop.eup %492  ;;  %v292_v0 = vadd.f32 0.5, %v284_v62  ;;  %506 = vtanh.f32 %v446_v49 }
 0x24f   :  { %v495_v2 = vpop.eup %494  ;;  %v287_v3 = vmul.f32 0.5, %v493_v63  ;;  %508 = vtanh.f32 %v443_v44 }
 0x250   :  { %310 = vrot.lane.b32.xlu0 %v292_v0, %s522_s19  ;;  %v282_v6 = vmul.f32 0.5, %v495_v2  ;;  %510 = vtanh.f32 %v249_v55 }
 0x251   :  { %v295_v4 = vadd.f32 0.5, %v287_v3  ;;  %512 = vtanh.f32 %v449_v53 }
 0x252   :  { %v290_v10 = vadd.f32 0.5, %v282_v6  ;;  %514 = vtanh.f32 %v617_v43 }
 0x253   :  { %v497_v7 = vpop.eup %496  ;;  %316 = vrot.lane.b32.xlu1 %v295_v4, %s522_s19  ;;  %516 = vtanh.f32 %v620_v51 }
 0x254   :  { %v499_v8 = vpop.eup %498  ;;  %312 = vrot.lane.b32.xlu0 %v293_v5, %s522_s19  ;;  %v289_v12 = vmul.f32 0.5, %v497_v7 }
 0x255   :  { %v288_v9 = vmul.f32 0.5, %v499_v8  ;;  %v501_v13 = vpop.eup %500 }
 0x256   :  { %v297_v14 = vadd.f32 0.5, %v289_v12  ;;  %v286_v15 = vmul.f32 0.5, %v501_v13  ;;  %v503_v17 = vpop.eup %502 }
 0x257   :  { %v296_v11 = vadd.f32 0.5, %v288_v9  ;;  %v505_v20 = vpop.eup %504 }
 0x258   :  { %306 = vrot.lane.b32.xlu0 %v290_v10, %s522_s19  ;;  %v294_v16 = vadd.f32 0.5, %v286_v15  ;;  %v507_v23 = vpop.eup %506 }
 0x259   :  { %318 = vrot.lane.b32.xlu1 %v296_v11, %s522_s19  ;;  %v509_v25 = vpop.eup %508 }
 0x25a   :  { %v511_v29 = vpop.eup %510 }
 0x25b   :  { %v513_v32 = vpop.eup %512 }
 0x25c   :  { %v515_v37 = vpop.eup %514 }
 0x25d   :  { %320 = vrot.lane.b32.xlu1 %v297_v14, %s522_s19  ;;  %v517_v43 = vpop.eup %516 }
 0x261   :  { %314 = vrot.lane.b32.xlu1 %v294_v16, %s522_s19 }
 0x2bd   :  { %v309_v18 = vpop.permute.xlu0 %308 }
 0x2be   :  { %v331_v19 = vmul.f32 %v503_v17, %v309_v18 }
 0x2c0   :  { %339 = vrot.lane.b32.xlu0 %v331_v19, %s521_s29 }
 0x2c2   :  { %v311_v21 = vpop.permute.xlu0 %310 }
 0x2c3   :  { %v332_v22 = vmul.f32 %v505_v20, %v311_v21 }
 0x2c5   :  { %343 = vrot.lane.b32.xlu0 %v332_v22, %s525_s21  ;;  %v317_v24 = vpop.permute.xlu1 %316 }
 0x2c6   :  { %v335_v26 = vmul.f32 %v507_v23, %v317_v24  ;;  %v313_v27 = vpop.permute.xlu0 %312 }
 0x2c7   :  { %v333_v28 = vmul.f32 %v509_v25, %v313_v27 }
 0x2c8   :  { %351 = vrot.lane.b32.xlu1 %v335_v26, %s521_s29 }
 0x2c9   :  { %347 = vrot.lane.b32.xlu0 %v333_v28, %s522_s19 }
 0x2ca   :  { %v307_v35 = vpop.permute.xlu0 %306 }
 0x2cb   :  { %v319_v30 = vpop.permute.xlu1 %318  ;;  %v330_v39 = vmul.f32 %v515_v37, %v307_v35 }
 0x2cc   :  { %v336_v31 = vmul.f32 %v511_v29, %v319_v30 }
 0x2ce   :  { %355 = vrot.lane.b32.xlu1 %v336_v31, %s525_s21 }
 0x2cf   :  { %v321_v33 = vpop.permute.xlu1 %320 }
 0x2d0   :  { %v337_v34 = vmul.f32 %v513_v32, %v321_v33 }
 0x2d2   :  { %359 = vrot.lane.b32.xlu1 %v337_v34, %s522_s19 }
 0x2d3   :  { %v315_v40 = vpop.permute.xlu1 %314 }
 0x2d4   :  { %v334_v48 = vmul.f32 %v517_v43, %v315_v40 }
 0x332   :  { %v340_v36 = vpop.permute.xlu0 %339 }
 0x333   :  { %v362_v41 = vsel %vm106_vm2, %v330_v39, %v340_v36 }
 0x337   :  { %v344_v38 = vpop.permute.xlu0 %343 }
 0x338   :  { %v363_v42 = vsel %vm26_vm1, %v362_v41, %v344_v38 }
 0x33a   :  { %v352_v45 = vpop.permute.xlu1 %351 }
 0x33b   :  { %v348_v44 = vpop.permute.xlu0 %347  ;;  %v366_v49 = vsel %vm106_vm2, %v334_v48, %v352_v45 }
 0x33c   :  { %v365_v46 = vsel %vm364_vm5, %v363_v42, %v348_v44 }
 0x33d   :  { %369 = vst [vmem:[%s653_s4] sm:$0xff] %v365_v46 }
 0x340   :  { %v356_v47 = vpop.permute.xlu1 %355 }
 0x341   :  { %v367_v50 = vsel %vm26_vm1, %v366_v49, %v356_v47 }
 0x344   :  { %v360_v51 = vpop.permute.xlu1 %359 }
 0x345   :  { %v368_v52 = vsel %vm364_vm5, %v367_v50, %v360_v51 }
 0x346   :  { %370 = vst [vmem:[%s653_s4 + $0x8] sm:$0xff] %v368_v52 }

</bundles_post_ra>
